<compile_context>
chip_gen: v7x
topology: tpu7x:2x2x1
jax: 0.10.0
libtpu: 0.0.40
codegen_flags: <defaults>
</compile_context>

<pallas_src>
import jax
import jax.numpy as jnp
from jax.experimental import pallas as pl
from jax.experimental.pallas import tpu as pltpu


def _round_up(a, b):
    return ((a + b - 1) // b) * b


def _levit_mlp_kernel(x_ref, w1_ref, b1_ref, w2_ref, b2_ref, o_ref):
    # x_ref : (TM, C_in)  native dtype (e.g. f32); cast to bf16 in-kernel
    # w1_ref: (C_in, H)   bf16  (BN1 scale pre-folded)
    # b1_ref: (1, H)      f32   (BN1 shift)
    # w2_ref: (H, C_out)  bf16  (BN2 scale * 1/6 pre-folded)
    # b2_ref: (1, C_out)  f32   (BN2 shift)
    # o_ref : (TM, C_out)

    # In-kernel cast of the input tile right before the MXU matmul.
    x = x_ref[...].astype(w1_ref.dtype)

    # --- LinearNorm 1: MXU matmul (f32 accumulate) + BN shift ---
    h = jnp.dot(x, w1_ref[...], preferred_element_type=jnp.float32)
    h = h + b1_ref[...]

    # --- Hardswish numerator only: x * clamp(x+3, 0, 6); the 1/6 is folded into W2 ---
    a = h * jnp.clip(h + 3.0, 0.0, 6.0)

    # Dropout(p=0.0) is the identity.

    # --- LinearNorm 2 ---
    y = jnp.dot(a.astype(w2_ref.dtype), w2_ref[...],
                preferred_element_type=jnp.float32)
    o_ref[...] = (y + b2_ref[...]).astype(o_ref.dtype)


def fold_levit_mlp_params(w1, s1, b1, w2, s2, b2, *, compute_dtype=jnp.bfloat16):
    """One-time (host/preprocessing-side) parameter folding.

    BN1 per-channel scale folded into W1 columns; BN2 scale and the hardswish
    1/6 folded into W2; shifts reshaped to (1, C) f32.
    """
    H = w1.shape[1]
    C_out = w2.shape[1]
    w1f = (w1 * s1[None, :]).astype(compute_dtype)
    w2f = (w2 * (s2[None, :] * (1.0 / 6.0))).astype(compute_dtype)
    b1r = b1.reshape(1, H).astype(jnp.float32)
    b2r = b2.reshape(1, C_out).astype(jnp.float32)
    return w1f, b1r, w2f, b2r


def levit_mlp_apply(x, w1f, b1r, w2f, b2r, *, tm=2048, out_dtype=None):
    """LeViT MLP: LinearNorm -> Hardswish -> Dropout(0) -> LinearNorm (eval mode).

    x: (B, N, C_in) in its native dtype; folded params from fold_levit_mlp_params.
    Returns (B, N, C_out) in `out_dtype` (default: the compute dtype, bf16).
    """
    B, N, C_in = x.shape
    H = w1f.shape[1]
    C_out = w2f.shape[1]
    M = B * N
    if out_dtype is None:
        out_dtype = w1f.dtype  # bf16 output by default (halves output HBM traffic)

    x2d = x.reshape(M, C_in)  # no pad, no pre-cast: ragged last tile handled by Pallas

    x_bytes = jnp.dtype(x.dtype).itemsize
    w_bytes = jnp.dtype(w1f.dtype).itemsize
    o_bytes = jnp.dtype(out_dtype).itemsize

    # --- tile the token dim ---
    tm = min(tm, _round_up(M, 16))
    # Keep >= 2 tiles when M is large enough so ("parallel",) gives both
    # TensorCores (v7x megacore) a tile to work on.
    if M > 512 and pl.cdiv(M, tm) < 2:
        tm = _round_up(pl.cdiv(M, 2), 16)

    def vmem_est(t):
        # double-buffered x / out tiles + (double-buffered) resident weights
        buf = (2 * t * C_in * x_bytes
               + 2 * t * C_out * o_bytes
               + 2 * (C_in * H + H * C_out) * w_bytes
               + 2 * (H + C_out) * 4)
        # in-kernel f32 intermediate h, its bf16 cast, and the f32 y
        tmp = t * H * 4 + t * H * w_bytes + t * C_out * 4
        return buf + tmp

    # Respect v7x's 64 MiB physical VMEM: halve the tile until it fits.
    while vmem_est(tm) * 3 // 2 > 56 * 1024 * 1024 and tm > 256:
        tm = max(256, _round_up(tm // 2, 16))

    grid_m = pl.cdiv(M, tm)
    vmem_limit = int(min(max(vmem_est(tm) * 3 // 2, 32 * 1024 * 1024),
                         64 * 1024 * 1024))

    cost = pl.CostEstimate(
        flops=2 * M * (C_in * H + H * C_out),
        transcendentals=0,
        bytes_accessed=(M * C_in * x_bytes            # x tiles (native dtype, read once)
                        + C_in * H * w_bytes          # w1 (resident)
                        + H * C_out * w_bytes         # w2 (resident)
                        + (H + C_out) * 4             # BN shifts
                        + M * C_out * o_bytes),       # output
    )

    out2d = pl.pallas_call(
        _levit_mlp_kernel,
        out_shape=jax.ShapeDtypeStruct((M, C_out), out_dtype),
        grid_spec=pltpu.PrefetchScalarGridSpec(
            num_scalar_prefetch=0,
            grid=(grid_m,),
            in_specs=[
                pl.BlockSpec((tm, C_in), lambda i: (i, 0)),   # x tile (pipelined)
                pl.BlockSpec((C_in, H), lambda i: (0, 0)),    # w1: VMEM-resident
                pl.BlockSpec((1, H), lambda i: (0, 0)),       # b1
                pl.BlockSpec((H, C_out), lambda i: (0, 0)),   # w2: VMEM-resident
                pl.BlockSpec((1, C_out), lambda i: (0, 0)),   # b2
            ],
            out_specs=pl.BlockSpec((tm, C_out), lambda i: (i, 0)),
        ),
        compiler_params=pltpu.CompilerParams(
            dimension_semantics=("parallel",),   # megacore sharding on v7x
            vmem_limit_bytes=vmem_limit,         # sized to actual footprint
        ),
        cost_estimate=cost,
    )(x2d, w1f, b1r, w2f, b2r)

    return out2d.reshape(B, N, C_out)


def levit_mlp(x, w1, s1, b1, w2, s2, b2, *, tm=2048, compute_dtype=jnp.bfloat16,
              out_dtype=None):
    """Convenience wrapper: fold params then apply (prefer folding once upfront)."""
    params = fold_levit_mlp_params(w1, s1, b1, w2, s2, b2, compute_dtype=compute_dtype)
    return levit_mlp_apply(x, *params, tm=tm, out_dtype=out_dtype)


def _fold_bn(gamma, beta, mean, var, eps=1e-5):
    scale = gamma / jnp.sqrt(var + eps)
    shift = beta - mean * scale
    return scale, shift


def _reference(x, w1, s1, b1, w2, s2, b2):
    B, N, C = x.shape
    h = x.reshape(B * N, C) @ w1
    h = h * s1 + b1
    h = h * jnp.clip(h + 3.0, 0.0, 6.0) / 6.0
    y = h @ w2
    y = y * s2 + b2
    return y.reshape(B, N, -1)


if __name__ == "__main__":
    # Stage-1 LeViT MLP shapes (dim=256, hidden=512), small token counts.
    in_features, hidden_features, out_features = 256, 512, 256

    key = jax.random.PRNGKey(0)
    k = jax.random.split(key, 12)

    # Linear weights (PyTorch stores (out, in); we pass transposed (in, out)).
    w1 = jax.random.normal(k[1], (in_features, hidden_features), jnp.float32) * 0.05
    w2 = jax.random.normal(k[2], (hidden_features, out_features), jnp.float32) * 0.05

    # BatchNorm1d params / running stats (deterministic, nontrivial).
    g1 = 1.0 + 0.1 * jax.random.normal(k[3], (hidden_features,), jnp.float32)
    be1 = 0.1 * jax.random.normal(k[4], (hidden_features,), jnp.float32)
    m1 = 0.1 * jax.random.normal(k[5], (hidden_features,), jnp.float32)
    v1 = jnp.abs(1.0 + 0.1 * jax.random.normal(k[6], (hidden_features,), jnp.float32))

    g2 = 1.0 + 0.1 * jax.random.normal(k[7], (out_features,), jnp.float32)
    be2 = 0.1 * jax.random.normal(k[8], (out_features,), jnp.float32)
    m2 = 0.1 * jax.random.normal(k[9], (out_features,), jnp.float32)
    v2 = jnp.abs(1.0 + 0.1 * jax.random.normal(k[10], (out_features,), jnp.float32))

    s1, b1 = _fold_bn(g1, be1, m1, v1)
    s2, b2 = _fold_bn(g2, be2, m2, v2)

    # One-time parameter folding, hoisted out of the per-call path.
    params = fold_levit_mlp_params(w1, s1, b1, w2, s2, b2)

    # --- Case 1: M divisible by the tile (two 64-row tiles; exercises the pipeline) ---
    B, N = 2, 64
    x = jax.random.normal(k[0], (B, N, in_features), dtype=jnp.float32)
    out = jax.block_until_ready(levit_mlp_apply(x, *params, tm=64))
    ref = _reference(x, w1, s1, b1, w2, s2, b2)
    assert out.shape == (B, N, out_features), out.shape
    # bf16 MXU inputs + bf16 output (f32 accumulation) -> loosened tolerance vs f32 ref.
    max_err = float(jnp.max(jnp.abs(out.astype(jnp.float32) - ref)))
    assert jnp.allclose(out.astype(jnp.float32), ref, atol=5e-2, rtol=5e-2), (
        f"mismatch vs reference (max abs err {max_err})")

    # --- Case 2: ragged last tile (M = 2*49 = 98, tm = 64) -> masked edge stores ---
    B2, N2 = 2, 49
    x2 = jax.random.normal(k[11], (B2, N2, in_features), dtype=jnp.float32)
    out2 = jax.block_until_ready(levit_mlp_apply(x2, *params, tm=64))
    ref2 = _reference(x2, w1, s1, b1, w2, s2, b2)
    assert out2.shape == (B2, N2, out_features), out2.shape
    max_err2 = float(jnp.max(jnp.abs(out2.astype(jnp.float32) - ref2)))
    assert jnp.allclose(out2.astype(jnp.float32), ref2, atol=5e-2, rtol=5e-2), (
        f"ragged-tile mismatch vs reference (max abs err {max_err2})")

    print("KERNEL_OK")
</pallas_src>

<mosaic_0001>
module attributes {stable_mosaic.version = 11 : i64} {
  func.func @_levit_mlp_kernel(%arg0: i32, %arg1: memref<64x256xf32, #tpu.memory_space<vmem>>, %arg2: memref<256x512xbf16, #tpu.memory_space<vmem>>, %arg3: memref<1x512xf32, #tpu.memory_space<vmem>>, %arg4: memref<512x256xbf16, #tpu.memory_space<vmem>>, %arg5: memref<1x256xf32, #tpu.memory_space<vmem>>, %arg6: memref<64x256xbf16, #tpu.memory_space<vmem>>) attributes {dimension_semantics = [#tpu.dimension_semantics<parallel>], iteration_bounds = array<i64: 2>, scalar_prefetch = 0 : i64, scratch_operands = 0 : i64, tpu.core_type = #tpu.core_type<tc>, window_params = [{transform_indices = @transform_0, window_bounds = array<i64: 64, 256>}, {pipeline_mode = #tpu.pipeline_mode<synchronous>, transform_indices = @transform_1, window_bounds = array<i64: 256, 512>}, {pipeline_mode = #tpu.pipeline_mode<synchronous>, transform_indices = @transform_2, window_bounds = array<i64: 1, 512>}, {pipeline_mode = #tpu.pipeline_mode<synchronous>, transform_indices = @transform_3, window_bounds = array<i64: 512, 256>}, {pipeline_mode = #tpu.pipeline_mode<synchronous>, transform_indices = @transform_4, window_bounds = array<i64: 1, 256>}, {transform_indices = @transform_5, window_bounds = array<i64: 64, 256>}]} {
    %c0 = arith.constant 0 : index
    %c0_0 = arith.constant 0 : index
    %0 = vector.load %arg1[%c0, %c0_0] : memref<64x256xf32, #tpu.memory_space<vmem>>, vector<64x256xf32>
    %1 = arith.truncf %0 : vector<64x256xf32> to vector<64x256xbf16>
    %c0_1 = arith.constant 0 : index
    %c0_2 = arith.constant 0 : index
    %2 = vector.load %arg2[%c0_1, %c0_2] : memref<256x512xbf16, #tpu.memory_space<vmem>>, vector<256x512xbf16>
    %cst = arith.constant dense<0.000000e+00> : vector<64x512xf32>
    %3 = tpu.matmul %1, %2, %cst {dimension_numbers = #tpu.dot_dimension_numbers<[1], [0], [0], [1], [0, 0, 1, 1], [], []>} : vector<64x256xbf16>, vector<256x512xbf16>, vector<64x512xf32> -> vector<64x512xf32>
    %c0_3 = arith.constant 0 : index
    %c0_4 = arith.constant 0 : index
    %4 = vector.load %arg3[%c0_3, %c0_4] : memref<1x512xf32, #tpu.memory_space<vmem>>, vector<1x512xf32>
    %5 = vector.broadcast %4 : vector<1x512xf32> to vector<64x512xf32>
    %6 = arith.addf %3, %5 : vector<64x512xf32>
    %cst_5 = arith.constant 3.000000e+00 : f32
    %7 = vector.broadcast %cst_5 : f32 to vector<64x512xf32>
    %8 = arith.addf %6, %7 : vector<64x512xf32>
    %cst_6 = arith.constant 0.000000e+00 : f32
    %cst_7 = arith.constant 6.000000e+00 : f32
    %9 = vector.broadcast %cst_6 : f32 to vector<64x512xf32>
    %10 = arith.maximumf %9, %8 : vector<64x512xf32>
    %11 = vector.broadcast %cst_7 : f32 to vector<64x512xf32>
    %12 = arith.minimumf %11, %10 : vector<64x512xf32>
    %13 = arith.mulf %6, %12 : vector<64x512xf32>
    %14 = arith.truncf %13 : vector<64x512xf32> to vector<64x512xbf16>
    %c0_8 = arith.constant 0 : index
    %c0_9 = arith.constant 0 : index
    %15 = vector.load %arg4[%c0_8, %c0_9] : memref<512x256xbf16, #tpu.memory_space<vmem>>, vector<512x256xbf16>
    %cst_10 = arith.constant dense<0.000000e+00> : vector<64x256xf32>
    %16 = tpu.matmul %14, %15, %cst_10 {dimension_numbers = #tpu.dot_dimension_numbers<[1], [0], [0], [1], [0, 0, 1, 1], [], []>} : vector<64x512xbf16>, vector<512x256xbf16>, vector<64x256xf32> -> vector<64x256xf32>
    %c0_11 = arith.constant 0 : index
    %c0_12 = arith.constant 0 : index
    %17 = vector.load %arg5[%c0_11, %c0_12] : memref<1x256xf32, #tpu.memory_space<vmem>>, vector<1x256xf32>
    %18 = vector.broadcast %17 : vector<1x256xf32> to vector<64x256xf32>
    %19 = arith.addf %16, %18 : vector<64x256xf32>
    %20 = arith.truncf %19 : vector<64x256xf32> to vector<64x256xbf16>
    %c0_13 = arith.constant 0 : index
    %c0_14 = arith.constant 0 : index
    %21 = vector.load %arg6[%c0_13, %c0_14] : memref<64x256xbf16, #tpu.memory_space<vmem>>, vector<64x256xbf16>
    tpu.vector_store %arg6[%c0_13, %c0_14], %20 {strides = array<i32>} : memref<64x256xbf16, #tpu.memory_space<vmem>>, vector<64x256xbf16>,
    return
  }
  func.func @transform_0(%arg0: i32) -> (i32, i32) {
    %c0_i32 = arith.constant 0 : i32
    %c0_i32_0 = arith.constant 0 : i32
    return %arg0, %c0_i32 : i32, i32
  }
  func.func @transform_1(%arg0: i32) -> (i32, i32) {
    %c0_i32 = arith.constant 0 : i32
    %c0_i32_0 = arith.constant 0 : i32
    %c0_i32_1 = arith.constant 0 : i32
    return %c0_i32, %c0_i32_0 : i32, i32
  }
  func.func @transform_2(%arg0: i32) -> (i32, i32) {
    %c0_i32 = arith.constant 0 : i32
    %c0_i32_0 = arith.constant 0 : i32
    %c0_i32_1 = arith.constant 0 : i32
    return %c0_i32, %c0_i32_0 : i32, i32
  }
  func.func @transform_3(%arg0: i32) -> (i32, i32) {
    %c0_i32 = arith.constant 0 : i32
    %c0_i32_0 = arith.constant 0 : i32
    %c0_i32_1 = arith.constant 0 : i32
    return %c0_i32, %c0_i32_0 : i32, i32
  }
  func.func @transform_4(%arg0: i32) -> (i32, i32) {
    %c0_i32 = arith.constant 0 : i32
    %c0_i32_0 = arith.constant 0 : i32
    %c0_i32_1 = arith.constant 0 : i32
    return %c0_i32, %c0_i32_0 : i32, i32
  }
  func.func @transform_5(%arg0: i32) -> (i32, i32) {
    %c0_i32 = arith.constant 0 : i32
    %c0_i32_0 = arith.constant 0 : i32
    return %arg0, %c0_i32 : i32, i32
  }
}

</mosaic_0001>

<bundles_post_ra>
// kernel: tpu_custom_call.1
= control target key start
LH: loop header
LB: loop body
LE: loop exit
PB: predicated region body
PF: predicated region fallthrough
CT: control target
= control target key end

     0   :  { %10 = vsyncpa [#allocation3], 0  ;;  %s2727_s0 = inlined_call_operand.hbm [shape: f32[128,256], index: 0, kind: input, shape index: {}]   ;;  %s2728_s1 = inlined_call_operand.hbm [shape: bf16[256,512], index: 1, kind: input, shape index: {}]   ;;  %s2729_s2 = inlined_call_operand.vmem [shape: f32[1,512], index: 2, kind: input, shape index: {}]   ;;  %s2730_s3 = inlined_call_operand.hbm [shape: bf16[512,256], index: 3, kind: input, shape index: {}]   ;;  %s2731_s4 = inlined_call_operand.vmem [shape: f32[1,256], index: 4, kind: input, shape index: {}]   ;;  %s2732_s5 = inlined_call_operand.hbm [shape: bf16[128,256], index: 5, kind: output, shape index: {}]  }
   0x1   :  { %12 = vsyncpa [#allocation3 + $0x1], 0 }
   0x2   :  { %13 = vsyncpa [#allocation6], 0 }
   0x3   :  { %14 = vsyncpa [#allocation4], 0 }
   0x4   :  { %16 = vsyncpa [#allocation4 + $0x1], 0  ;;  %s2363_s18 = smov 0   ;;  %s2365_s19 = smov 0  }
   0x5   :  { %s2367_s20 = smov 0   ;;  %s2369_s21 = smov 0  }
   0x6 LB: > { %s2384_s22 = sadd.s32 4294967295, %s2321_s21   ;;  %s1700_s23 = sadd.s32 4294967294, %s2321_s21   ;;  %s2321_s21 = sphi %s2369_s21, %s2752_s21   ;;  %s2317_s20 = sphi %s2367_s20, %s2751_s20   ;;  %s2313_s19 = sphi %s2365_s19, %s2750_s19   ;;  %s2309_s18 = sphi %s2363_s18, %s2749_s18  }
   0x7   : > { %p42_p0 = scmp.ne.s32.totalorder %s2313_s19, %s2309_s18  ;;  %p2733_p1 = scmp.eq.s32.totalorder %s2384_s22, 0 }
   0x8   : > { %p156_p3 = scmp.eq.s32.totalorder %s1700_s23, 1  ;;  %p1701_p5 = scmp.ge.s32.totalorder %s2321_s21, 1 }
   0x9   : > { %p2393_p4 = por %p2733_p1, %p42_p0  ;;  %p163_p7 = scmp.lt.s32.totalorder %s2321_s21, 3 }
   0xa   : > { %p2398_p6 = por %p156_p3, %p42_p0  ;;  %s2323_s27 = smov [#allocation5]  }
   0xb   : > { %s2736_s24 = scalar_select %p2393_p4, 1, 0 }
   0xc   : > { %s2737_s25 = scalar_select %p2398_p6, 1, 0 }
   0xd   : > { %p2403_p8 = pnand %p1701_p5, %p163_p7  ;;  %s175_s28 = sshll.u32 %s2323_s27, 4  ;;  %s2407_s28 = int_to_ptr.vmem [resolvable:$true] %s175_s28 }
   0xe   : > { %s2324_s30 = smov [#allocation7]   ;;  %s2165_s9 = scalar_lea.hbm %s2728_s1, 8192 }
   0xf   : > { %p1912_p9 = pneg %p2403_p8  ;;  %s191_s6 = sshll.u32 %s2324_s30, 4  ;;  %s2418_s6 = int_to_ptr.vmem [resolvable:$true] %s191_s6 }
  0x10   : > { %p2166_p12 = scmp.ne.s32.totalorder %s2728_s1, %s2165_s9  ;;  %p2172_p5 = scmp.lt.u32.totalorder %s2165_s9, %s2728_s1 }
  0x11   : > { %p2414_p11 = pnand %p1912_p9, %p2733_p1 }
  0x13   : > { %p2167_p13 = pneg %p2414_p11 }
  0x15   : > { %p2168_p0 = pnand %p2167_p13, %p2166_p12 }
  0x17   : > { %p2169_p3 = pneg %p2168_p0 }
  0x19   : > { %p2174_p7 = pnand %p2172_p5, %p2169_p3 }
  0x1b   : > { %2177 = shalt.err (!%p2174_p7)
}
  0x1c   : > { %s2178_s14 = scalar_lea.vmem %s2407_s28, 8192  ;;  %p2186_p2 = scmp.lt.s32.totalorder %s2407_s28, %s2407_s28 }
  0x1d   : > { %p2179_p9 = scmp.ne.s32.totalorder %s2407_s28, %s2178_s14  ;;  %p2187_p12 = scmp.lt.s32.totalorder %s2178_s14, %s2178_s14 }
  0x1f   : > { %p2181_p10 = pnand %p2179_p9, %p2167_p13  ;;  %p2188_p0 = por %p2187_p12, %p2186_p2 }
  0x21   : > { %p2182_p1 = pneg %p2181_p10 }
  0x23   : > { %p2189_p6 = pnand %p2188_p0, %p2182_p1 }
  0x25   : > { %2192 = shalt.err (!%p2189_p6)
}
  0x26   : > { %s2325_s15 = smov 256   ;;  %s2326_s16 = smov 16  }
  0x27   : > { %1915 = dma.hbm_to_vmem [thread:$0]  (!%p2414_p11), %s2728_s1, 8192, %s2407_s28, [#allocation6], %s2325_s15, %s2325_s15, %s2326_s16  }
  0x28   : > { %s2193_s7 = scalar_lea.hbm %s2730_s3, 8192 }
  0x29   : > { %p2194_p1 = scmp.ne.s32.totalorder %s2730_s3, %s2193_s7  ;;  %p2200_p10 = scmp.lt.u32.totalorder %s2193_s7, %s2730_s3 }
  0x2b   : > { %p2196_p2 = pnand %p2194_p1, %p2167_p13 }
  0x2d   : > { %p2197_p6 = pneg %p2196_p2 }
  0x2f   : > { %p2202_p3 = pnand %p2200_p10, %p2197_p6 }
  0x31   : > { %2205 = shalt.err (!%p2202_p3)
}
  0x32   : > { %s2206_s28 = scalar_lea.vmem %s2418_s6, 8192  ;;  %p2214_p12 = scmp.lt.s32.totalorder %s2418_s6, %s2418_s6 }
  0x33   : > { %p2207_p5 = scmp.ne.s32.totalorder %s2418_s6, %s2206_s28  ;;  %p2215_p0 = scmp.lt.s32.totalorder %s2206_s28, %s2206_s28 }
  0x35   : > { %p2209_p7 = pnand %p2207_p5, %p2167_p13  ;;  %p2216_p1 = por %p2215_p0, %p2214_p12 }
  0x37   : > { %p2210_p9 = pneg %p2209_p7 }
  0x39   : > { %p2217_p2 = pnand %p2216_p1, %p2210_p9 }
  0x3b   : > { %2220 = shalt.err (!%p2217_p2)
}
  0x3c   : > { %s2327_s12 = smov 128   ;;  %s2328_s13 = smov 8  }
  0x3d   : > { %1918 = dma.hbm_to_vmem [thread:$0]  (!%p2414_p11), %s2730_s3, 8192, %s2418_s6, [#allocation6], %s2327_s12, %s2327_s12, %s2328_s13  }
  0x3e   : > { %s2476_s23 = sadd.s32 1, %s2321_s21   ;;  %s29_s30 = sadd.s32 1, %s2317_s20 }
  0x3f   : > { %s26_s27 = ssub.s32 %s2321_s21, %s2476_s23  ;;  %p36_p6 = scmp.ne.s32.totalorder %s2317_s20, %s2313_s19 }
  0x40   : > { %p27_p13 = scmp.eq.s32.totalorder %s26_s27, 0  ;;  %p37_p10 = scmp.eq.s32.totalorder %s2321_s21, 0 }
  0x41   : > { %p2740_p5 = scmp.eq.s32.totalorder %s2384_s22, 1  ;;  %p1929_p9 = scmp.lt.s32.totalorder %s2321_s21, 2 }
  0x42   : > { %s2485_s7 = scalar_select %p27_p13, %s2317_s20, %s29_s30  }
  0x43   : > { %p38_p3 = por %p37_p10, %p36_p6  ;;  %p2489_p7 = por %p2740_p5, %p36_p6 }
  0x44   : > { %s208_s29 = sand.u32 1, %s2317_s20   ;;  %s1857_s6 = sshll.u32 %s2321_s21, 11 }
  0x45   : > { %s2741_s8 = scalar_select %p2489_p7, 1, 0 }
  0x46   : > { %s1705_s9 = sshll.u32 %s208_s29, 7  ;;  %s2499_s28 = scalar_lea.hbm %s2727_s0, %s1857_s6 }
  0x47   : > { %s212_s12 = scalar_lea.vmem [#allocation2], %s1705_s9  ;;  %p2503_p11 = pnand %p1929_p9, %p38_p3 }
  0x48   : > { %s220_s13 = sshll.u32 %s212_s12, 4  ;;  %s2507_s17 = scalar_lea.sflag [#allocation3], %s208_s29  ;;  %s2501_s13 = int_to_ptr.vmem [resolvable:$true] %s220_s13 }
  0x49   : > { %s2221_s27 = scalar_lea.hbm %s2499_s28, 2048  ;;  %p2223_p0 = pneg %p2503_p11 }
  0x4a   : > { %p2222_p12 = scmp.ne.s32.totalorder %s2499_s28, %s2221_s27  ;;  %s2226_s6 = scalar_lea.hbm %s2727_s0, 4096 }
  0x4b   : > { %p2227_p13 = scmp.lt.u32.totalorder %s2499_s28, %s2727_s0  ;;  %p2228_p6 = scmp.lt.u32.totalorder %s2226_s6, %s2221_s27 }
  0x4c   : > { %p2224_p1 = pnand %p2223_p0, %p2222_p12  ;;  %p2230_p3 = scmp.lt.u32.totalorder %s2221_s27, %s2499_s28 }
  0x4d   : > { %p2229_p10 = por %p2228_p6, %p2227_p13 }
  0x4e   : > { %p2225_p2 = pneg %p2224_p1 }
  0x4f   : > { %p2231_p5 = por %p2230_p3, %p2229_p10 }
  0x51   : > { %p2232_p9 = pnand %p2231_p5, %p2225_p2 }
  0x53   : > { %2235 = shalt.err (!%p2232_p9)
}
  0x54   : > { %s2236_s29 = scalar_lea.vmem %s2501_s13, 2048  ;;  %s2329_s12 = smov [#allocation2]  }
  0x55   : > { %p2237_p12 = scmp.ne.s32.totalorder %s2501_s13, %s2236_s29  ;;  %s2241_s30 = sshll.u32 %s2329_s12, 4  ;;  %s2242_s30 = int_to_ptr.vmem [resolvable:$false] %s2241_s30 }
  0x56   : > { %s2243_s9 = scalar_lea.vmem %s2242_s30, 4096  ;;  %p2244_p4 = scmp.lt.s32.totalorder %s2501_s13, %s2242_s30 }
  0x57   : > { %p2239_p1 = pnand %p2237_p12, %p2223_p0  ;;  %p2245_p13 = scmp.lt.s32.totalorder %s2243_s9, %s2236_s29 }
  0x59   : > { %p2240_p7 = pneg %p2239_p1  ;;  %p2246_p6 = por %p2245_p13, %p2244_p4 }
  0x5b   : > { %p2247_p10 = pnand %p2246_p6, %p2240_p7 }
  0x5d   : > { %2250 = shalt.err (!%p2247_p10)
}
  0x5e   : > { %1922 = dma.hbm_to_vmem [thread:$0]  (!%p2503_p11), %s2499_s28, 2048, %s2501_s13, %s2507_s17, %s2325_s15, %s2325_s15, %s2326_s16  }
  0x5f   : > { %232 = sbr.rel (%p2403_p8) target bundleno = 721 (0x2d1), region = 40  ;;  %s2541_s27 = sand.u32 (!%p2403_p8), 1, %s2313_s19  }
  0x60   : > { %s1710_s6 = sshll.u32 (!%p2403_p8), %s2541_s27, 7  ;;  %s235_s10 = scalar_lea.sflag (!%p2403_p8), [#allocation3], %s2541_s27 }
  0x61   : > { %s2545_s11 = scalar_lea.vmem (!%p2403_p8), [#allocation2], %s1710_s6  ;;  %p2743_p4 = scmp.ne.s32.totalorder (!%p2403_p8), %s2736_s24, 0 }
  0x66   : > { %2296 = dma.done.wait (%p2743_p4), %s235_s10, 2048  }
  0x67   : > { %2298 = vsyncadd (%p2743_p4), %s235_s10, 4294965248  ;;  %p2744_p7 = scmp.eq.s32.totalorder %s2384_s22, 0 }
  0x69   : > { %2300 = dma.done.wait (%p2744_p7), [#allocation6], 16384   ;;  %p2745_p8 = pmov %p2744_p7 }
  0x6a   : > { %v1973_v0 = vld [vmem:[#allocation5 + $0x4] ss:$16 sps:$4 sm:$0xff]   ;;  %v1975_v1 = vld [vmem:[#allocation5] ss:$16 sps:$4 sm:$0xff]   ;;  %v276_v13 = vld [vmem:[%s2545_s11 + $0x8] sm:$0xff]  ;;  %s1713_s28 = sshll.u32 %s2541_s27, 6 }
  0x6b   : > { %2302 = vsyncadd (%p2745_p8), [#allocation6], 4294950912  ;;  %705 = vmatprep.subr.bf16.mxu1 %v1973_v0  ;;  %v1976_v2 = vld [vmem:[#allocation5 + $0x24] ss:$16 sps:$4 sm:$0xff]   ;;  %v1978_v3 = vld [vmem:[#allocation5 + $0x20] ss:$16 sps:$4 sm:$0xff]  }
  0x6c   : > { %706 = vmatpush1.bf16.msra.mxu1 %v1975_v1  ;;  %v1979_v4 = vld [vmem:[#allocation5 + $0x44] ss:$16 sps:$4 sm:$0xff]   ;;  %v1981_v5 = vld [vmem:[#allocation5 + $0x40] ss:$16 sps:$4 sm:$0xff]   ;;  %v278_v14 = vld [vmem:[%s2545_s11 + $0x18] sm:$0xff]  ;;  %s2666_s13 = scalar_lea.vmem [#allocation8], %s1713_s28 }
  0x6d   : > { %707 = vmatprep.subr.bf16.mxu1 %v1976_v2  ;;  %v1982_v6 = vld [vmem:[#allocation5 + $0x64] ss:$16 sps:$4 sm:$0xff]   ;;  %v1984_v7 = vld [vmem:[#allocation5 + $0x60] ss:$16 sps:$4 sm:$0xff]   ;;  %v2557_v15 = vpack.c.bf16 %v278_v14, %v276_v13  ;;  %v2023_v44 = vld [vmem:[#allocation5 + $0xc] ss:$16 sps:$4 sm:$0xff]  }
  0x6e   : > { %v1985_v8 = vld [vmem:[#allocation5 + $0x84] ss:$16 sps:$4 sm:$0xff]   ;;  %v1987_v9 = vld [vmem:[#allocation5 + $0x80] ss:$16 sps:$4 sm:$0xff]   ;;  %v280_v45 = vld [vmem:[%s2545_s11 + $0x28] sm:$0xff]  ;;  %s1608_s14 = sshll.u32 %s2666_s13, 4  ;;  %s2676_s14 = int_to_ptr.vmem [resolvable:$true] %s1608_s14 }
  0x6f   : > { %v1988_v10 = vld [vmem:[#allocation5 + $0xa4] ss:$16 sps:$4 sm:$0xff]   ;;  %v1990_v11 = vld [vmem:[#allocation5 + $0xa0] ss:$16 sps:$4 sm:$0xff]   ;;  %737 = vmatprep.mubr.bf16.mxu1 %v2557_v15  ;;  %v282_v46 = vld [vmem:[%s2545_s11 + $0x38] sm:$0xff]  ;;  %s1867_s17 = sshll.u32 %s2384_s22, 10 }
  0x70   : > { %708 = vmatpush1.bf16.msra.mxu1 %v1978_v3  ;;  %v1991_v12 = vld [vmem:[#allocation5 + $0xc4] ss:$16 sps:$4 sm:$0xff]   ;;  %v1993_v16 = vld [vmem:[#allocation5 + $0xc0] ss:$16 sps:$4 sm:$0xff]   ;;  %v2021_v50 = vld [vmem:[#allocation5 + $0x8] ss:$16 sps:$4 sm:$0xff]   ;;  %v2566_v52 = vpack.c.bf16 %v282_v46, %v280_v45  ;;  %s2681_s30 = scalar_lea.hbm %s2732_s5, %s1867_s17 }
  0x71   : > { %709 = vmatprep.subr.bf16.mxu1 %v1979_v4  ;;  %v1994_v17 = vld [vmem:[#allocation5 + $0xe4] ss:$16 sps:$4 sm:$0xff]   ;;  %v1996_v18 = vld [vmem:[#allocation5 + $0xe0] ss:$16 sps:$4 sm:$0xff]   ;;  %v2026_v51 = vld [vmem:[#allocation5 + $0x2c] ss:$16 sps:$4 sm:$0xff]  }
  0x72   : > { %v1997_v19 = vld [vmem:[#allocation5 + $0x104] ss:$16 sps:$4 sm:$0xff]   ;;  %v1999_v20 = vld [vmem:[#allocation5 + $0x100] ss:$16 sps:$4 sm:$0xff]   ;;  %v2024_v55 = vld [vmem:[#allocation5 + $0x28] ss:$16 sps:$4 sm:$0xff]  }
  0x73   : > { %v2000_v21 = vld [vmem:[#allocation5 + $0x124] ss:$16 sps:$4 sm:$0xff]   ;;  %v2002_v22 = vld [vmem:[#allocation5 + $0x120] ss:$16 sps:$4 sm:$0xff]   ;;  %v2029_v58 = vld [vmem:[#allocation5 + $0x4c] ss:$16 sps:$4 sm:$0xff]  }
  0x74   : > { %710 = vmatpush1.bf16.msra.mxu1 %v1981_v5  ;;  %v2003_v23 = vld [vmem:[#allocation5 + $0x144] ss:$16 sps:$4 sm:$0xff]   ;;  %v2005_v24 = vld [vmem:[#allocation5 + $0x140] ss:$16 sps:$4 sm:$0xff]   ;;  %v284_v59 = vld [vmem:[%s2545_s11 + $0x48] sm:$0xff]  ;;  %s1594_s9 = scalar_lea.sflag [#allocation4], %s2541_s27 }
  0x75   : > { %711 = vmatprep.subr.bf16.mxu1 %v1982_v6  ;;  %v2006_v25 = vld [vmem:[#allocation5 + $0x164] ss:$16 sps:$4 sm:$0xff]   ;;  %v2008_v26 = vld [vmem:[#allocation5 + $0x160] ss:$16 sps:$4 sm:$0xff]   ;;  %v286_v60 = vld [vmem:[%s2545_s11 + $0x58] sm:$0xff]  ;;  %s2251_s6 = scalar_lea.vmem %s2676_s14, 1024 }
  0x76   : > { %v2009_v27 = vld [vmem:[#allocation5 + $0x184] ss:$16 sps:$4 sm:$0xff]   ;;  %v2011_v28 = vld [vmem:[#allocation5 + $0x180] ss:$16 sps:$4 sm:$0xff]   ;;  %v2027_v63 = vld [vmem:[#allocation5 + $0x48] ss:$16 sps:$4 sm:$0xff]   ;;  %v2576_v3 = vpack.c.bf16 %v286_v60, %v284_v59  ;;  %p2252_p11 = scmp.ne.s32.totalorder %s2676_s14, %s2251_s6 }
  0x77   : > { %v2012_v29 = vld [vmem:[#allocation5 + $0x1a4] ss:$16 sps:$4 sm:$0xff]   ;;  %v2071_v31 = vld [vmem:[#allocation7] ss:$8 sps:$4 sm:$0xff]   ;;  %v2074_v35 = vld [vmem:[#allocation7 + $0x10] ss:$8 sps:$4 sm:$0xff]  }
  0x78   : > { %712 = vmatpush1.bf16.msra.mxu1 %v1984_v7  ;;  %v2069_v30 = vld [vmem:[#allocation7 + $0x4] ss:$8 sps:$4 sm:$0xff]   ;;  %v2014_v32 = vld [vmem:[#allocation5 + $0x1a0] ss:$16 sps:$4 sm:$0xff]   ;;  %v2072_v33 = vld [vmem:[#allocation7 + $0x14] ss:$8 sps:$4 sm:$0xff]  }
  0x79   : > { %713 = vmatprep.subr.bf16.mxu1 %v1985_v8  ;;  %1391 = vmatprep.subr.bf16.mxu0 %v2069_v30  ;;  %v2015_v34 = vld [vmem:[#allocation5 + $0x1c4] ss:$16 sps:$4 sm:$0xff]   ;;  %v2017_v37 = vld [vmem:[#allocation5 + $0x1c0] ss:$16 sps:$4 sm:$0xff]   ;;  %v2032_v0 = vld [vmem:[#allocation5 + $0x6c] ss:$16 sps:$4 sm:$0xff]  }
  0x7a   : > { %1392 = vmatpush1.bf16.msra.mxu0 %v2071_v31  ;;  %v2075_v36 = vld [vmem:[#allocation7 + $0x24] ss:$8 sps:$4 sm:$0xff]   ;;  %v2077_v39 = vld [vmem:[#allocation7 + $0x20] ss:$8 sps:$4 sm:$0xff]   ;;  %v2078_v40 = vld [vmem:[#allocation7 + $0x34] ss:$8 sps:$4 sm:$0xff]  }
  0x7b   : > { %1393 = vmatprep.subr.bf16.mxu0 %v2072_v33  ;;  %v2018_v38 = vld [vmem:[#allocation5 + $0x1e4] ss:$16 sps:$4 sm:$0xff]   ;;  %v2020_v41 = vld [vmem:[#allocation5 + $0x1e0] ss:$16 sps:$4 sm:$0xff]   ;;  %v2030_v5 = vld [vmem:[#allocation5 + $0x68] ss:$16 sps:$4 sm:$0xff]  }
  0x7c   : > { %714 = vmatpush1.bf16.msra.mxu1 %v1987_v9  ;;  %v275_v42 = vld [vmem:[%s2545_s11] sm:$0xff]  ;;  %v277_v43 = vld [vmem:[%s2545_s11 + $0x10] sm:$0xff]  ;;  %v2035_v8 = vld [vmem:[#allocation5 + $0x8c] ss:$16 sps:$4 sm:$0xff]   ;;  %p2746_p0 = scmp.ne.s32.totalorder %s2741_s8, 0  ;;  %s2330_s22 = smov [#allocation8]  }
  0x7d   : > { %715 = vmatprep.subr.bf16.mxu1 %v1988_v10  ;;  %v2080_v47 = vld [vmem:[#allocation7 + $0x30] ss:$8 sps:$4 sm:$0xff]   ;;  %v2081_v48 = vld [vmem:[#allocation7 + $0x44] ss:$8 sps:$4 sm:$0xff]   ;;  %v2564_v49 = vpack.c.bf16 %v277_v43, %v275_v42  ;;  %v2083_v53 = vld [vmem:[#allocation7 + $0x40] ss:$8 sps:$4 sm:$0xff]  }
  0x7e   : > { %1394 = vmatpush1.bf16.msra.mxu0 %v2074_v35  ;;  %v2084_v54 = vld [vmem:[#allocation7 + $0x54] ss:$8 sps:$4 sm:$0xff]   ;;  %v279_v56 = vld [vmem:[%s2545_s11 + $0x20] sm:$0xff]  ;;  %v2086_v61 = vld [vmem:[#allocation7 + $0x50] ss:$8 sps:$4 sm:$0xff]   ;;  %p2253_p2 = pnand %p2252_p11, %p2746_p0  ;;  %s2255_s10 = sshll.u32 %s2330_s22, 4  ;;  %s2256_s10 = int_to_ptr.vmem [resolvable:$false] %s2255_s10 }
  0x7f   : > { %1395 = vmatprep.subr.bf16.mxu0 %v2075_v36  ;;  %v281_v57 = vld [vmem:[%s2545_s11 + $0x30] sm:$0xff]  ;;  %v2087_v62 = vld [vmem:[#allocation7 + $0x64] ss:$8 sps:$4 sm:$0xff]   ;;  %v2089_v2 = vld [vmem:[#allocation7 + $0x60] ss:$8 sps:$4 sm:$0xff]   ;;  %p2258_p5 = scmp.lt.s32.totalorder %s2676_s14, %s2256_s10 }
  0x80   : > { %716 = vmatpush1.bf16.msra.mxu1 %v1990_v11  ;;  %v2574_v1 = vpack.c.bf16 %v281_v57, %v279_v56  ;;  %v2090_v4 = vld [vmem:[#allocation7 + $0x74] ss:$8 sps:$4 sm:$0xff]   ;;  %v283_v6 = vld [vmem:[%s2545_s11 + $0x40] sm:$0xff]  ;;  %v288_v9 = vld [vmem:[%s2545_s11 + $0x68] sm:$0xff]  ;;  %v365_v57 = vlaneseq  ;;  %p2254_p3 = pneg %p2253_p2 }
  0x81   : > { %717 = vmatprep.subr.bf16.mxu1 %v1991_v12  ;;  %v285_v7 = vld [vmem:[%s2545_s11 + $0x50] sm:$0xff]  ;;  %v290_v10 = vld [vmem:[%s2545_s11 + $0x78] sm:$0xff]  ;;  %v2093_v12 = vld [vmem:[#allocation7 + $0x84] ss:$8 sps:$4 sm:$0xff]  }
  0x82   : > { %1396 = vmatpush1.bf16.msra.mxu0 %v2077_v39  ;;  %v2092_v11 = vld [vmem:[#allocation7 + $0x70] ss:$8 sps:$4 sm:$0xff]   ;;  %v2584_v13 = vpack.c.bf16 %v285_v7, %v283_v6  ;;  %v2102_v30 = vld [vmem:[#allocation7 + $0xb4] ss:$8 sps:$4 sm:$0xff]   ;;  %v2119_v56 = vld [vmem:[#allocation7 + $0x104] ss:$8 sps:$4 sm:$0xff]  }
  0x83   : > { %1397 = vmatprep.subr.bf16.mxu0 %v2078_v40  ;;  %v2033_v14 = vld [vmem:[#allocation5 + $0x88] ss:$16 sps:$4 sm:$0xff]   ;;  %v2050_v35 = vld [vmem:[#allocation5 + $0x12c] ss:$16 sps:$4 sm:$0xff]   ;;  %v2605_v60 = vld [vmem:[%s2729_s2] sm:$0xf] }
  0x84   : > { %718 = vmatpush1.bf16.msra.mxu1 %v1993_v16  ;;  %v2586_v16 = vpack.c.bf16 %v290_v10, %v288_v9  ;;  %v2042_v31 = vld [vmem:[#allocation5 + $0xe8] ss:$16 sps:$4 sm:$0xff]   ;;  %v2056_v39 = vld [vmem:[#allocation5 + $0x16c] ss:$16 sps:$4 sm:$0xff]  }
  0x85   : > { %719 = vmatprep.subr.bf16.mxu1 %v1994_v17  ;;  %v2038_v17 = vld [vmem:[#allocation5 + $0xac] ss:$16 sps:$4 sm:$0xff]   ;;  %v2104_v33 = vld [vmem:[#allocation7 + $0xb0] ss:$8 sps:$4 sm:$0xff]  }
  0x86   : > { %1398 = vmatpush1.bf16.msra.mxu0 %v2080_v47  ;;  %v2048_v36 = vld [vmem:[#allocation5 + $0x128] ss:$16 sps:$4 sm:$0xff]   ;;  %v2059_v40 = vld [vmem:[#allocation5 + $0x18c] ss:$16 sps:$4 sm:$0xff]  }
  0x87   : > { %1399 = vmatprep.subr.bf16.mxu0 %v2081_v48  ;;  %v2062_v42 = vld [vmem:[#allocation5 + $0x1ac] ss:$16 sps:$4 sm:$0xff]   ;;  %v2060_v43 = vld [vmem:[#allocation5 + $0x1a8] ss:$16 sps:$4 sm:$0xff]  }
  0x88   : > { %720 = vmatpush1.bf16.msra.mxu1 %v1996_v18  ;;  %v2095_v18 = vld [vmem:[#allocation7 + $0x80] ss:$8 sps:$4 sm:$0xff]   ;;  %v2068_v46 = vld [vmem:[#allocation5 + $0x1ec] ss:$16 sps:$4 sm:$0xff]  }
  0x89   : > { %721 = vmatprep.subr.bf16.mxu1 %v1997_v19  ;;  %v2096_v19 = vld [vmem:[#allocation7 + $0x94] ss:$8 sps:$4 sm:$0xff]   ;;  %v2063_v45 = vld [vmem:[#allocation5 + $0x1c8] ss:$16 sps:$4 sm:$0xff]   ;;  %v2105_v48 = vld [vmem:[#allocation7 + $0xc4] ss:$8 sps:$4 sm:$0xff]  }
  0x8a   : > { %1400 = vmatpush1.bf16.msra.mxu0 %v2083_v53  ;;  %v2066_v47 = vld [vmem:[#allocation5 + $0x1e8] ss:$16 sps:$4 sm:$0xff]  }
  0x8b   : > { %1401 = vmatprep.subr.bf16.mxu0 %v2084_v54  ;;  %v2110_v53 = vld [vmem:[#allocation7 + $0xd0] ss:$8 sps:$4 sm:$0xff]   ;;  %v2113_v54 = vld [vmem:[#allocation7 + $0xe0] ss:$8 sps:$4 sm:$0xff]  }
  0x8c   : > { %722 = vmatpush1.bf16.msra.mxu1 %v1999_v20  ;;  %v2036_v20 = vld [vmem:[#allocation5 + $0xa8] ss:$16 sps:$4 sm:$0xff]  }
  0x8d   : > { %723 = vmatprep.subr.bf16.mxu1 %v2000_v21  ;;  %v287_v21 = vld [vmem:[%s2545_s11 + $0x60] sm:$0xff] }
  0x8e   : > { %1402 = vmatpush1.bf16.msra.mxu0 %v2086_v61 }
  0x8f   : > { %1403 = vmatprep.subr.bf16.mxu0 %v2087_v62 }
  0x90   : > { %724 = vmatpush1.bf16.msra.mxu1 %v2002_v22  ;;  %v289_v22 = vld [vmem:[%s2545_s11 + $0x70] sm:$0xff]  ;;  %s2257_s11 = scalar_lea.vmem %s2256_s10, 2048 }
  0x91   : > { %725 = vmatprep.subr.bf16.mxu1 %v2003_v23  ;;  %v2041_v23 = vld [vmem:[#allocation5 + $0xcc] ss:$16 sps:$4 sm:$0xff]   ;;  %p2259_p9 = scmp.lt.s32.totalorder %s2257_s11, %s2251_s6 }
  0x92   : > { %1404 = vmatpush1.bf16.msra.mxu0 %v2089_v2 }
  0x93   : > { %1405 = vmatprep.subr.bf16.mxu0 %v2090_v4  ;;  %p2260_p12 = por %p2259_p9, %p2258_p5 }
  0x94   : > { %726 = vmatpush1.bf16.msra.mxu1 %v2005_v24  ;;  %v2098_v24 = vld [vmem:[#allocation7 + $0x90] ss:$8 sps:$4 sm:$0xff]  }
  0x95   : > { %727 = vmatprep.subr.bf16.mxu1 %v2006_v25  ;;  %v2099_v25 = vld [vmem:[#allocation7 + $0xa4] ss:$8 sps:$4 sm:$0xff]   ;;  %p2261_p1 = pnand %p2260_p12, %p2254_p3 }
  0x96   : > { %1406 = vmatpush1.bf16.msra.mxu0 %v2092_v11 }
  0x97   : > { %1407 = vmatprep.subr.bf16.mxu0 %v2093_v12 }
  0x98   : > { %728 = vmatpush1.bf16.msra.mxu1 %v2008_v26  ;;  %v297_v26 = vpack.c.bf16 %v289_v22, %v287_v21 }
  0x99   : > { %729 = vmatprep.subr.bf16.mxu1 %v2009_v27  ;;  %v2039_v27 = vld [vmem:[#allocation5 + $0xc8] ss:$16 sps:$4 sm:$0xff]  }
  0x9a   : > { %1408 = vmatpush1.bf16.msra.mxu0 %v2095_v18 }
  0x9b   : > { %1409 = vmatprep.subr.bf16.mxu0 %v2096_v19 }
  0x9c   : > { %730 = vmatpush1.bf16.msra.mxu1 %v2011_v28  ;;  %v2044_v28 = vld [vmem:[#allocation5 + $0xec] ss:$16 sps:$4 sm:$0xff]  }
  0x9d   : > { %731 = vmatprep.subr.bf16.mxu1 %v2012_v29  ;;  %v2101_v29 = vld [vmem:[#allocation7 + $0xa0] ss:$8 sps:$4 sm:$0xff]  }
  0x9e   : > { %1410 = vmatpush1.bf16.msra.mxu0 %v2098_v24 }
  0x9f   : > { %1411 = vmatprep.subr.bf16.mxu0 %v2099_v25 }
  0xa0   : > { %732 = vmatpush1.bf16.msra.mxu1 %v2014_v32  ;;  %v2047_v32 = vld [vmem:[#allocation5 + $0x10c] ss:$16 sps:$4 sm:$0xff]  }
  0xa1   : > { %733 = vmatprep.subr.bf16.mxu1 %v2015_v34  ;;  %v2045_v34 = vld [vmem:[#allocation5 + $0x108] ss:$16 sps:$4 sm:$0xff]  }
  0xa2   : > { %1412 = vmatpush1.bf16.msra.mxu0 %v2101_v29 }
  0xa3   : > { %1413 = vmatprep.subr.bf16.mxu0 %v2102_v30 }
  0xa4   : > { %734 = vmatpush1.bf16.msra.mxu1 %v2017_v37  ;;  %v2053_v37 = vld [vmem:[#allocation5 + $0x14c] ss:$16 sps:$4 sm:$0xff]  }
  0xa5   : > { %735 = vmatprep.subr.bf16.mxu1 %v2018_v38  ;;  %v2051_v38 = vld [vmem:[#allocation5 + $0x148] ss:$16 sps:$4 sm:$0xff]  }
  0xa6   : > { %1414 = vmatpush1.bf16.msra.mxu0 %v2104_v33 }
  0xa7   : > { %1415 = vmatprep.subr.bf16.mxu0 %v2105_v48 }
  0xa8   : > { %736 = vmatpush1.bf16.msra.mxu1 %v2020_v41  ;;  %v2057_v41 = vld [vmem:[#allocation5 + $0x188] ss:$16 sps:$4 sm:$0xff]  }
  0xa9   : > { %778 = vmatprep.subr.bf16.mxu1 %v2023_v44  ;;  %v2065_v44 = vld [vmem:[#allocation5 + $0x1cc] ss:$16 sps:$4 sm:$0xff]  }
  0xab   : > { %738 = vmatmul.mubr.bf16.vlgmr.msra.gmra.mrb[0].mxu1 %v2564_v49 }
  0xac   : > { %779 = vmatpush1.bf16.msra.mxu1 %v2021_v50  ;;  %747 = vmatprep.mubr.bf16.mxu1 %v2566_v52  ;;  %v2107_v50 = vld [vmem:[#allocation7 + $0xc0] ss:$8 sps:$4 sm:$0xff]  }
  0xad   : > { %780 = vmatprep.subr.bf16.mxu1 %v2026_v51  ;;  %1416 = vmatpush1.bf16.msra.mxu0 %v2107_v50  ;;  %v2108_v51 = vld [vmem:[#allocation7 + $0xd4] ss:$8 sps:$4 sm:$0xff]  }
  0xae   : > { %1417 = vmatprep.subr.bf16.mxu0 %v2108_v51 }
  0xb0   : > { %781 = vmatpush1.bf16.msra.mxu1 %v2024_v55  ;;  %v2116_v55 = vld [vmem:[#allocation7 + $0xf0] ss:$8 sps:$4 sm:$0xff]  }
  0xb1   : > { %782 = vmatprep.subr.bf16.mxu1 %v2029_v58  ;;  %1418 = vmatpush1.bf16.msra.mxu0 %v2110_v53  ;;  %v2599_v58 = vshrl.u32 %v365_v57, 7  ;;  %v2120_v53 = vld [vmem:[#allocation7 + $0x110] ss:$8 sps:$4 sm:$0xff]  }
  0xb3   : > { %748 = vmatmul.mubr.bf16.gmra.mrb[4].mxu1 %v2574_v1  ;;  %v367_v59 = vsub.s32 0, %v2599_v58  ;;  %v371_v61 = vsub.s32 1, %v2599_v58 }
  0xb4   : > { %783 = vmatpush1.bf16.msra.mxu1 %v2027_v63  ;;  %757 = vmatprep.mubr.bf16.mxu1 %v2576_v3 }
  0xb5   : > { %784 = vmatprep.subr.bf16.mxu1 %v2032_v0  ;;  %v2611_v62 = vrot.slane %v2605_v60, %v367_v59  ;;  %v2616_v63 = vrot.slane %v2605_v60, %v371_v61 }
  0xb8   : > { %785 = vmatpush1.bf16.msra.mxu1 %v2030_v5 }
  0xb9   : > { %786 = vmatprep.subr.bf16.mxu1 %v2035_v8 }
  0xbb   : > { %758 = vmatmul.mubr.bf16.gmra.mrb[8].mxu1 %v2584_v13 }
  0xbc   : > { %787 = vmatpush1.bf16.msra.mxu1 %v2033_v14  ;;  %767 = vmatprep.mubr.bf16.mxu1 %v2586_v16 }
  0xbd   : > { %788 = vmatprep.subr.bf16.mxu1 %v2038_v17 }
  0xc0   : > { %789 = vmatpush1.bf16.msra.mxu1 %v2036_v20 }
  0xc1   : > { %790 = vmatprep.subr.bf16.mxu1 %v2041_v23 }
  0xc3   : > { %768 = vmatmul.mubr.bf16.gmra.mrb[12].mxu1 %v297_v26 }
  0xc4   : > { %791 = vmatpush1.bf16.msra.mxu1 %v2039_v27  ;;  %810 = vmatprep.mubr.bf16.mxu1 %v2557_v15  ;;  %v2054_v15 = vld [vmem:[#allocation5 + $0x168] ss:$16 sps:$4 sm:$0xff]  }
  0xc5   : > { %792 = vmatprep.subr.bf16.mxu1 %v2044_v28 }
  0xc8   : > { %793 = vmatpush1.bf16.msra.mxu1 %v2042_v31 }
  0xc9   : > { %794 = vmatprep.subr.bf16.mxu1 %v2047_v32 }
  0xcc   : > { %795 = vmatpush1.bf16.msra.mxu1 %v2045_v34 }
  0xcd   : > { %796 = vmatprep.subr.bf16.mxu1 %v2050_v35 }
  0xd0   : > { %797 = vmatpush1.bf16.msra.mxu1 %v2048_v36 }
  0xd1   : > { %798 = vmatprep.subr.bf16.mxu1 %v2053_v37 }
  0xd4   : > { %799 = vmatpush1.bf16.msra.mxu1 %v2051_v38 }
  0xd5   : > { %800 = vmatprep.subr.bf16.mxu1 %v2056_v39  ;;  %v2117_v39 = vld [vmem:[#allocation7 + $0x100] ss:$8 sps:$4 sm:$0xff]  }
  0xd8   : > { %801 = vmatpush1.bf16.msra.mxu1 %v2054_v15 }
  0xd9   : > { %802 = vmatprep.subr.bf16.mxu1 %v2059_v40 }
  0xdc   : > { %803 = vmatpush1.bf16.msra.mxu1 %v2057_v41  ;;  %v2122_v41 = vld [vmem:[#allocation7 + $0x114] ss:$8 sps:$4 sm:$0xff]  }
  0xdd   : > { %804 = vmatprep.subr.bf16.mxu1 %v2062_v42 }
  0xe0   : > { %805 = vmatpush1.bf16.msra.mxu1 %v2060_v43 }
  0xe1   : > { %806 = vmatprep.subr.bf16.mxu1 %v2065_v44 }
  0xe4   : > { %807 = vmatpush1.bf16.msra.mxu1 %v2063_v45 }
  0xe5   : > { %808 = vmatprep.subr.bf16.mxu1 %v2068_v46 }
  0xe8   : > { %809 = vmatpush1.bf16.msra.mxu1 %v2066_v47 }
  0xeb   : > { %811 = vmatmul.mubr.bf16.vlgmr.msra.gmra.mrb[16].mxu1 %v2564_v49  ;;  %v2111_v49 = vld [vmem:[#allocation7 + $0xe4] ss:$8 sps:$4 sm:$0xff]  }
  0xec   : > { %820 = vmatprep.mubr.bf16.mxu1 %v2566_v52  ;;  %1419 = vmatprep.subr.bf16.mxu0 %v2111_v49  ;;  %v2114_v52 = vld [vmem:[#allocation7 + $0xf4] ss:$8 sps:$4 sm:$0xff]  }
  0xed   : > { %1420 = vmatpush1.bf16.msra.mxu0 %v2113_v54 }
  0xee   : > { %1421 = vmatprep.subr.bf16.mxu0 %v2114_v52 }
  0xf1   : > { %1422 = vmatpush1.bf16.msra.mxu0 %v2116_v55 }
  0xf2   : > { %1464 = vmatprep.subr.bf16.mxu0 %v2119_v56  ;;  %v2125_v56 = vld [vmem:[#allocation7 + $0x124] ss:$8 sps:$4 sm:$0xff]  }
  0xf3   : > { %821 = vmatmul.mubr.bf16.gmra.mrb[20].mxu1 %v2574_v1 }
  0xf4   : > { %830 = vmatprep.mubr.bf16.mxu1 %v2576_v3 }
  0xfb   : > { %831 = vmatmul.mubr.bf16.gmra.mrb[24].mxu1 %v2584_v13 }
  0xfc   : > { %840 = vmatprep.mubr.bf16.mxu1 %v2586_v16 }
 0x103   : > { %841 = vmatmul.mubr.bf16.gmra.mrb[28].mxu1 %v297_v26 }
 0x17e   : > { %v739_v0 = vpop.f32.mrb[0].mxu1 }
 0x17f   : > { %v740_v1 = vadd.f32 %v739_v0, %v2611_v62  ;;  %v741_v2 = vpop.f32.mrb[1].mxu1 }
 0x180   : > { %v742_v3 = vadd.f32 %v741_v2, %v2616_v63  ;;  %v743_v4 = vpop.f32.mrb[2].mxu1 }
 0x181   : > { %v851_v5 = vadd.f32 3.0, %v740_v1  ;;  %v744_v6 = vadd.f32 %v743_v4, %v2611_v62  ;;  %v745_v7 = vpop.f32.mrb[3].mxu1 }
 0x182   : > { %v852_v8 = vadd.f32 3.0, %v742_v3  ;;  %v746_v9 = vadd.f32 %v745_v7, %v2616_v63 }
 0x183   : > { %v883_v10 = vmax.f32 %v851_v5, 0.0  ;;  %v855_v11 = vadd.f32 3.0, %v744_v6 }
 0x184   : > { %v884_v12 = vmax.f32 %v852_v8, 0.0  ;;  %v856_v13 = vadd.f32 3.0, %v746_v9 }
 0x185   : > { %v915_v14 = vmin.f32 %v883_v10, 6.0  ;;  %v887_v16 = vmax.f32 %v855_v11, 0.0 }
 0x186   : > { %v916_v17 = vmin.f32 %v884_v12, 6.0  ;;  %v888_v18 = vmax.f32 %v856_v13, 0.0  ;;  %v749_v19 = vpop.f32.mrb[4].mxu1  ;;  %v2128_v13 = vld [vmem:[#allocation7 + $0x134] ss:$8 sps:$4 sm:$0xff]  }
 0x187   : > { %v919_v20 = vmin.f32 %v887_v16, 6.0  ;;  %v750_v21 = vadd.f32 %v749_v19, %v2611_v62  ;;  %v751_v22 = vpop.f32.mrb[5].mxu1  ;;  %v947_v26 = vmul.f32 %v915_v14, %v740_v1 }
 0x188   : > { %v920_v23 = vmin.f32 %v888_v18, 6.0  ;;  %v752_v24 = vadd.f32 %v751_v22, %v2616_v63  ;;  %v753_v25 = vpop.f32.mrb[6].mxu1  ;;  %v948_v31 = vmul.f32 %v916_v17, %v742_v3 }
 0x189   : > { %v951_v27 = vmul.f32 %v919_v20, %v744_v6  ;;  %v859_v28 = vadd.f32 3.0, %v750_v21  ;;  %v754_v29 = vadd.f32 %v753_v25, %v2611_v62  ;;  %v755_v30 = vpop.f32.mrb[7].mxu1 }
 0x18a   : > { %v952_v32 = vmul.f32 %v920_v23, %v746_v9  ;;  %v860_v33 = vadd.f32 3.0, %v752_v24  ;;  %v756_v34 = vadd.f32 %v755_v30, %v2616_v63  ;;  %v2123_v9 = vld [vmem:[#allocation7 + $0x120] ss:$8 sps:$4 sm:$0xff]  }
 0x18b   : > { %v979_v35 = vpack.c.bf16 %v951_v27, %v947_v26  ;;  %v891_v36 = vmax.f32 %v859_v28, 0.0  ;;  %v863_v37 = vadd.f32 3.0, %v754_v29 }
 0x18c   : > { %v980_v38 = vpack.c.bf16 %v952_v32, %v948_v31  ;;  %v892_v15 = vmax.f32 %v860_v33, 0.0  ;;  %v864_v40 = vadd.f32 3.0, %v756_v34 }
 0x18d   : > { %v923_v42 = vmin.f32 %v891_v36, 6.0  ;;  %v895_v43 = vmax.f32 %v863_v37, 0.0 }
 0x18e   : > { %1423 = vmatprep.mubr.bf16.mxu0 %v980_v38  ;;  %v924_v44 = vmin.f32 %v892_v15, 6.0  ;;  %v896_v45 = vmax.f32 %v864_v40, 0.0  ;;  %v759_v46 = vpop.f32.mrb[8].mxu1  ;;  %v2129_v15 = vld [vmem:[#allocation7 + $0x140] ss:$8 sps:$4 sm:$0xff]  }
 0x18f   : > { %1424 = vmatmul.mubr.bf16.vlgmr.msra.gmra.mrb[0].mxu0 %v979_v35  ;;  %v955_v47 = vmul.f32 %v923_v42, %v750_v21  ;;  %v927_v48 = vmin.f32 %v895_v43, 6.0  ;;  %v760_v50 = vadd.f32 %v759_v46, %v2611_v62  ;;  %v761_v51 = vpop.f32.mrb[9].mxu1  ;;  %v2134_v43 = vld [vmem:[#allocation7 + $0x154] ss:$8 sps:$4 sm:$0xff]  }
 0x190   : > { %1465 = vmatpush1.bf16.msra.mxu0 %v2117_v39  ;;  %v956_v49 = vmul.f32 %v924_v44, %v752_v24  ;;  %v928_v54 = vmin.f32 %v896_v45, 6.0  ;;  %v762_v52 = vadd.f32 %v761_v51, %v2616_v63  ;;  %v763_v55 = vpop.f32.mrb[10].mxu1  ;;  %v2126_v24 = vld [vmem:[#allocation7 + $0x130] ss:$8 sps:$4 sm:$0xff]  }
 0x191   : > { %1466 = vmatprep.subr.bf16.mxu0 %v2122_v41  ;;  %v959_v57 = vmul.f32 %v927_v48, %v754_v29  ;;  %v867_v0 = vadd.f32 3.0, %v760_v50  ;;  %v764_v1 = vadd.f32 %v763_v55, %v2611_v62  ;;  %v765_v2 = vpop.f32.mrb[11].mxu1  ;;  %v2131_v29 = vld [vmem:[#allocation7 + $0x144] ss:$8 sps:$4 sm:$0xff]   ;;  %v2135_v55 = vld [vmem:[#allocation7 + $0x160] ss:$8 sps:$4 sm:$0xff]  }
 0x192   : > { %v960_v3 = vmul.f32 %v928_v54, %v756_v34  ;;  %v868_v4 = vadd.f32 3.0, %v762_v52  ;;  %v766_v5 = vadd.f32 %v765_v2, %v2616_v63  ;;  %v2141_v2 = vld [vmem:[#allocation7 + $0x180] ss:$8 sps:$4 sm:$0xff]  }
 0x193   : > { %v899_v6 = vmax.f32 %v867_v0, 0.0  ;;  %v871_v7 = vadd.f32 3.0, %v764_v1  ;;  %v983_v8 = vpack.c.bf16 %v959_v57, %v955_v47  ;;  %v2140_v57 = vld [vmem:[#allocation7 + $0x174] ss:$8 sps:$4 sm:$0xff]   ;;  %v2138_v0 = vld [vmem:[#allocation7 + $0x170] ss:$8 sps:$4 sm:$0xff]  }
 0x194   : > { %1467 = vmatpush1.bf16.msra.mxu0 %v2120_v53  ;;  %v900_v10 = vmax.f32 %v868_v4, 0.0  ;;  %v872_v11 = vadd.f32 3.0, %v766_v5  ;;  %v984_v12 = vpack.c.bf16 %v960_v3, %v956_v49  ;;  %v2137_v53 = vld [vmem:[#allocation7 + $0x164] ss:$8 sps:$4 sm:$0xff]   ;;  %v2146_v3 = vld [vmem:[#allocation7 + $0x194] ss:$8 sps:$4 sm:$0xff]  }
 0x195   : > { %1468 = vmatprep.subr.bf16.mxu0 %v2125_v56  ;;  %v931_v14 = vmin.f32 %v899_v6, 6.0  ;;  %v903_v16 = vmax.f32 %v871_v7, 0.0  ;;  %v2144_v4 = vld [vmem:[#allocation7 + $0x190] ss:$8 sps:$4 sm:$0xff]   ;;  %v2147_v6 = vld [vmem:[#allocation7 + $0x1a0] ss:$8 sps:$4 sm:$0xff]  }
 0x196   : > { %v932_v17 = vmin.f32 %v900_v10, 6.0  ;;  %v904_v18 = vmax.f32 %v872_v11, 0.0  ;;  %v769_v19 = vpop.f32.mrb[12].mxu1  ;;  %1433 = vmatprep.mubr.bf16.mxu0 %v984_v12  ;;  %v2152_v7 = vld [vmem:[#allocation7 + $0x1b4] ss:$8 sps:$4 sm:$0xff]   ;;  %v379_v10 = vsub.s32 3, %v2599_v58 }
 0x197   : > { %v963_v20 = vmul.f32 %v931_v14, %v760_v50  ;;  %v935_v21 = vmin.f32 %v903_v16, 6.0  ;;  %v770_v22 = vadd.f32 %v769_v19, %v2611_v62  ;;  %v771_v23 = vpop.f32.mrb[13].mxu1  ;;  %1434 = vmatmul.mubr.bf16.gmra.mrb[4].mxu0 %v983_v8  ;;  %v375_v8 = vsub.s32 2, %v2599_v58  ;;  %v2155_v11 = vld [vmem:[#allocation7 + $0x1c4] ss:$8 sps:$4 sm:$0xff]  }
 0x198   : > { %1469 = vmatpush1.bf16.msra.mxu0 %v2123_v9  ;;  %v964_v25 = vmul.f32 %v932_v17, %v762_v52  ;;  %v936_v26 = vmin.f32 %v904_v18, 6.0  ;;  %v772_v27 = vadd.f32 %v771_v23, %v2616_v63  ;;  %v773_v28 = vpop.f32.mrb[14].mxu1  ;;  %v2150_v9 = vld [vmem:[#allocation7 + $0x1b0] ss:$8 sps:$4 sm:$0xff]   ;;  %v2153_v14 = vld [vmem:[#allocation7 + $0x1c0] ss:$8 sps:$4 sm:$0xff]  }
 0x199   : > { %1470 = vmatprep.subr.bf16.mxu0 %v2128_v13  ;;  %v967_v30 = vmul.f32 %v935_v21, %v764_v1  ;;  %v875_v31 = vadd.f32 3.0, %v770_v22  ;;  %v774_v32 = vadd.f32 %v773_v28, %v2611_v62  ;;  %v775_v33 = vpop.f32.mrb[15].mxu1  ;;  %v2143_v1 = vld [vmem:[#allocation7 + $0x184] ss:$8 sps:$4 sm:$0xff]   ;;  %v2637_v12 = vrot.slane %v2605_v60, %v375_v8  ;;  %v2158_v16 = vld [vmem:[#allocation7 + $0x1d4] ss:$8 sps:$4 sm:$0xff]  }
 0x19a   : > { %v968_v34 = vmul.f32 %v936_v26, %v766_v5  ;;  %v876_v35 = vadd.f32 3.0, %v772_v27  ;;  %v776_v36 = vadd.f32 %v775_v33, %v2616_v63  ;;  %v2132_v63 = vld [vmem:[#allocation7 + $0x150] ss:$8 sps:$4 sm:$0xff]   ;;  %v2149_v5 = vld [vmem:[#allocation7 + $0x1a4] ss:$8 sps:$4 sm:$0xff]   ;;  %v2640_v13 = vrot.slane %v2605_v60, %v379_v10 }
 0x19b   : > { %v907_v37 = vmax.f32 %v875_v31, 0.0  ;;  %v879_v38 = vadd.f32 3.0, %v774_v32  ;;  %v987_v39 = vpack.c.bf16 %v967_v30, %v963_v20  ;;  %v2161_v26 = vld [vmem:[#allocation7 + $0x1e4] ss:$8 sps:$4 sm:$0xff]  }
 0x19c   : > { %1471 = vmatpush1.bf16.msra.mxu0 %v2126_v24  ;;  %v908_v40 = vmax.f32 %v876_v35, 0.0  ;;  %v880_v41 = vadd.f32 3.0, %v776_v36  ;;  %v988_v42 = vpack.c.bf16 %v968_v34, %v964_v25  ;;  %v2164_v35 = vld [vmem:[#allocation7 + $0x1f4] ss:$8 sps:$4 sm:$0xff]  }
 0x19d   : > { %1472 = vmatprep.subr.bf16.mxu0 %v2131_v29  ;;  %v939_v44 = vmin.f32 %v907_v37, 6.0  ;;  %v911_v45 = vmax.f32 %v879_v38, 0.0 }
 0x19e   : > { %v940_v46 = vmin.f32 %v908_v40, 6.0  ;;  %v912_v47 = vmax.f32 %v880_v41, 0.0  ;;  %1443 = vmatprep.mubr.bf16.mxu0 %v988_v42 }
 0x19f   : > { %v971_v62 = vmul.f32 %v939_v44, %v770_v22  ;;  %v943_v48 = vmin.f32 %v911_v45, 6.0  ;;  %1444 = vmatmul.mubr.bf16.gmra.mrb[8].mxu0 %v987_v39  ;;  %v2156_v22 = vld [vmem:[#allocation7 + $0x1d0] ss:$8 sps:$4 sm:$0xff]  }
 0x1a0   : > { %1473 = vmatpush1.bf16.msra.mxu0 %v2129_v15  ;;  %v972_v50 = vmul.f32 %v940_v46, %v772_v27  ;;  %v944_v51 = vmin.f32 %v912_v47, 6.0  ;;  %v2162_v44 = vld [vmem:[#allocation7 + $0x1f0] ss:$8 sps:$4 sm:$0xff]  }
 0x1a1   : > { %1474 = vmatprep.subr.bf16.mxu0 %v2134_v43  ;;  %v975_v49 = vmul.f32 %v943_v48, %v774_v32  ;;  %v2159_v32 = vld [vmem:[#allocation7 + $0x1e0] ss:$8 sps:$4 sm:$0xff]  }
 0x1a2   : > { %v976_v54 = vmul.f32 %v944_v51, %v776_v36 }
 0x1a3   : > { %v991_v52 = vpack.c.bf16 %v975_v49, %v971_v62 }
 0x1a4   : > { %1475 = vmatpush1.bf16.msra.mxu0 %v2132_v63  ;;  %v992_v56 = vpack.c.bf16 %v976_v54, %v972_v50 }
 0x1a5   : > { %1476 = vmatprep.subr.bf16.mxu0 %v2137_v53 }
 0x1a6   : > { %1453 = vmatprep.mubr.bf16.mxu0 %v992_v56 }
 0x1a7   : > { %1454 = vmatmul.mubr.bf16.gmra.mrb[12].mxu0 %v991_v52 }
 0x1a8   : > { %1477 = vmatpush1.bf16.msra.mxu0 %v2135_v55 }
 0x1a9   : > { %1478 = vmatprep.subr.bf16.mxu0 %v2140_v57 }
 0x1ac   : > { %1479 = vmatpush1.bf16.msra.mxu0 %v2138_v0 }
 0x1ad   : > { %1480 = vmatprep.subr.bf16.mxu0 %v2143_v1 }
 0x1b0   : > { %1481 = vmatpush1.bf16.msra.mxu0 %v2141_v2 }
 0x1b1   : > { %1482 = vmatprep.subr.bf16.mxu0 %v2146_v3 }
 0x1b4   : > { %1483 = vmatpush1.bf16.msra.mxu0 %v2144_v4 }
 0x1b5   : > { %1484 = vmatprep.subr.bf16.mxu0 %v2149_v5 }
 0x1b8   : > { %1485 = vmatpush1.bf16.msra.mxu0 %v2147_v6 }
 0x1b9   : > { %1486 = vmatprep.subr.bf16.mxu0 %v2152_v7 }
 0x1bc   : > { %1487 = vmatpush1.bf16.msra.mxu0 %v2150_v9 }
 0x1bd   : > { %1488 = vmatprep.subr.bf16.mxu0 %v2155_v11 }
 0x1be   : > { %v812_v17 = vpop.f32.mrb[16].mxu1 }
 0x1bf   : > { %v813_v18 = vadd.f32 %v812_v17, %v2637_v12  ;;  %v814_v19 = vpop.f32.mrb[17].mxu1 }
 0x1c0   : > { %v815_v20 = vadd.f32 %v814_v19, %v2640_v13  ;;  %v816_v21 = vpop.f32.mrb[18].mxu1  ;;  %1489 = vmatpush1.bf16.msra.mxu0 %v2153_v14 }
 0x1c1   : > { %v853_v23 = vadd.f32 3.0, %v813_v18  ;;  %v817_v24 = vadd.f32 %v816_v21, %v2637_v12  ;;  %v818_v25 = vpop.f32.mrb[19].mxu1  ;;  %1490 = vmatprep.subr.bf16.mxu0 %v2158_v16 }
 0x1c2   : > { %v854_v60 = vadd.f32 3.0, %v815_v20  ;;  %v819_v27 = vadd.f32 %v818_v25, %v2640_v13 }
 0x1c3   : > { %v885_v28 = vmax.f32 %v853_v23, 0.0  ;;  %v857_v29 = vadd.f32 3.0, %v817_v24 }
 0x1c4   : > { %v886_v30 = vmax.f32 %v854_v60, 0.0  ;;  %v858_v31 = vadd.f32 3.0, %v819_v27  ;;  %1491 = vmatpush1.bf16.msra.mxu0 %v2156_v22 }
 0x1c5   : > { %v917_v33 = vmin.f32 %v885_v28, 6.0  ;;  %v889_v34 = vmax.f32 %v857_v29, 0.0  ;;  %1492 = vmatprep.subr.bf16.mxu0 %v2161_v26 }
 0x1c6   : > { %v918_v36 = vmin.f32 %v886_v30, 6.0  ;;  %v890_v37 = vmax.f32 %v858_v31, 0.0  ;;  %v822_v38 = vpop.f32.mrb[20].mxu1 }
 0x1c7   : > { %v921_v39 = vmin.f32 %v889_v34, 6.0  ;;  %v823_v15 = vadd.f32 %v822_v38, %v2637_v12  ;;  %v824_v40 = vpop.f32.mrb[21].mxu1  ;;  %v949_v45 = vmul.f32 %v917_v33, %v813_v18 }
 0x1c8   : > { %v922_v41 = vmin.f32 %v890_v37, 6.0  ;;  %v825_v42 = vadd.f32 %v824_v40, %v2640_v13  ;;  %v826_v43 = vpop.f32.mrb[22].mxu1  ;;  %1493 = vmatpush1.bf16.msra.mxu0 %v2159_v32  ;;  %v950_v63 = vmul.f32 %v918_v36, %v815_v20 }
 0x1c9   : > { %v953_v46 = vmul.f32 %v921_v39, %v817_v24  ;;  %v861_v47 = vadd.f32 3.0, %v823_v15  ;;  %v827_v62 = vadd.f32 %v826_v43, %v2637_v12  ;;  %v828_v48 = vpop.f32.mrb[23].mxu1  ;;  %1494 = vmatprep.subr.bf16.mxu0 %v2164_v35 }
 0x1ca   : > { %v954_v50 = vmul.f32 %v922_v41, %v819_v27  ;;  %v862_v51 = vadd.f32 3.0, %v825_v42  ;;  %v829_v53 = vadd.f32 %v828_v48, %v2640_v13 }
 0x1cb   : > { %v981_v49 = vpack.c.bf16 %v953_v46, %v949_v45  ;;  %v893_v54 = vmax.f32 %v861_v47, 0.0  ;;  %v865_v52 = vadd.f32 3.0, %v827_v62 }
 0x1cc   : > { %v894_v55 = vmax.f32 %v862_v51, 0.0  ;;  %v866_v56 = vadd.f32 3.0, %v829_v53  ;;  %1495 = vmatpush1.bf16.msra.mxu0 %v2162_v44  ;;  %v982_v57 = vpack.c.bf16 %v954_v50, %v950_v63 }
 0x1cd   : > { %v925_v0 = vmin.f32 %v893_v54, 6.0  ;;  %v897_v1 = vmax.f32 %v865_v52, 0.0 }
 0x1ce   : > { %v926_v2 = vmin.f32 %v894_v55, 6.0  ;;  %v898_v3 = vmax.f32 %v866_v56, 0.0  ;;  %v832_v4 = vpop.f32.mrb[24].mxu1  ;;  %1496 = vmatprep.mubr.bf16.mxu0 %v982_v57 }
 0x1cf   : > { %v929_v5 = vmin.f32 %v897_v1, 6.0  ;;  %v833_v6 = vadd.f32 %v832_v4, %v2637_v12  ;;  %v834_v7 = vpop.f32.mrb[25].mxu1  ;;  %1497 = vmatmul.mubr.bf16.vlgmr.msra.gmra.mrb[0].mxu0 %v981_v49  ;;  %v957_v11 = vmul.f32 %v925_v0, %v823_v15 }
 0x1d0   : > { %v930_v8 = vmin.f32 %v898_v3, 6.0  ;;  %v835_v9 = vadd.f32 %v834_v7, %v2640_v13  ;;  %v836_v10 = vpop.f32.mrb[26].mxu1  ;;  %v958_v19 = vmul.f32 %v926_v2, %v825_v42  ;;  %v1059_v3 = vld [vmem:[%s2731_s4] sm:$0x3] }
 0x1d1   : > { %v961_v14 = vmul.f32 %v929_v5, %v827_v62  ;;  %v869_v16 = vadd.f32 3.0, %v833_v6  ;;  %v837_v17 = vadd.f32 %v836_v10, %v2637_v12  ;;  %v838_v18 = vpop.f32.mrb[27].mxu1  ;;  %v1064_v4 = vrot.slane %v1059_v3, %v367_v59 }
 0x1d2   : > { %v962_v20 = vmul.f32 %v930_v8, %v829_v53  ;;  %v870_v21 = vadd.f32 3.0, %v835_v9  ;;  %v839_v22 = vadd.f32 %v838_v18, %v2640_v13  ;;  %v1068_v5 = vrot.slane %v1059_v3, %v371_v61 }
 0x1d3   : > { %v901_v23 = vmax.f32 %v869_v16, 0.0  ;;  %v873_v24 = vadd.f32 3.0, %v837_v17  ;;  %v985_v25 = vpack.c.bf16 %v961_v14, %v957_v11 }
 0x1d4   : > { %v902_v26 = vmax.f32 %v870_v21, 0.0  ;;  %v874_v60 = vadd.f32 3.0, %v839_v22  ;;  %v986_v27 = vpack.c.bf16 %v962_v20, %v958_v19 }
 0x1d5   : > { %v933_v28 = vmin.f32 %v901_v23, 6.0  ;;  %v905_v29 = vmax.f32 %v873_v24, 0.0 }
 0x1d6   : > { %v934_v30 = vmin.f32 %v902_v26, 6.0  ;;  %v906_v31 = vmax.f32 %v874_v60, 0.0  ;;  %v842_v32 = vpop.f32.mrb[28].mxu1  ;;  %1506 = vmatprep.mubr.bf16.mxu0 %v986_v27 }
 0x1d7   : > { %v937_v33 = vmin.f32 %v905_v29, 6.0  ;;  %v843_v34 = vadd.f32 %v842_v32, %v2637_v12  ;;  %v844_v35 = vpop.f32.mrb[29].mxu1  ;;  %1507 = vmatmul.mubr.bf16.gmra.mrb[4].mxu0 %v985_v25  ;;  %v965_v39 = vmul.f32 %v933_v28, %v833_v6 }
 0x1d8   : > { %v938_v36 = vmin.f32 %v906_v31, 6.0  ;;  %v845_v37 = vadd.f32 %v844_v35, %v2640_v13  ;;  %v846_v38 = vpop.f32.mrb[30].mxu1  ;;  %v966_v43 = vmul.f32 %v934_v30, %v835_v9 }
 0x1d9   : > { %v969_v15 = vmul.f32 %v937_v33, %v837_v17  ;;  %v877_v40 = vadd.f32 3.0, %v843_v34  ;;  %v847_v41 = vadd.f32 %v846_v38, %v2637_v12  ;;  %v848_v42 = vpop.f32.mrb[31].mxu1 }
 0x1da   : > { %v970_v44 = vmul.f32 %v938_v36, %v839_v22  ;;  %v878_v45 = vadd.f32 3.0, %v845_v37  ;;  %v849_v46 = vadd.f32 %v848_v42, %v2640_v13 }
 0x1db   : > { %v909_v47 = vmax.f32 %v877_v40, 0.0  ;;  %v881_v62 = vadd.f32 3.0, %v847_v41  ;;  %v989_v48 = vpack.c.bf16 %v969_v15, %v965_v39 }
 0x1dc   : > { %v910_v63 = vmax.f32 %v878_v45, 0.0  ;;  %v882_v50 = vadd.f32 3.0, %v849_v46  ;;  %v990_v51 = vpack.c.bf16 %v970_v44, %v966_v43 }
 0x1dd   : > { %v941_v53 = vmin.f32 %v909_v47, 6.0  ;;  %v913_v49 = vmax.f32 %v881_v62, 0.0 }
 0x1de   : > { %v942_v54 = vmin.f32 %v910_v63, 6.0  ;;  %v914_v52 = vmax.f32 %v882_v50, 0.0  ;;  %1516 = vmatprep.mubr.bf16.mxu0 %v990_v51 }
 0x1df   : > { %v945_v55 = vmin.f32 %v913_v49, 6.0  ;;  %1517 = vmatmul.mubr.bf16.gmra.mrb[8].mxu0 %v989_v48  ;;  %v973_v56 = vmul.f32 %v941_v53, %v843_v34 }
 0x1e0   : > { %v946_v12 = vmin.f32 %v914_v52, 6.0  ;;  %v974_v0 = vmul.f32 %v942_v54, %v845_v37 }
 0x1e1   : > { %v977_v57 = vmul.f32 %v945_v55, %v847_v41 }
 0x1e2   : > { %v978_v1 = vmul.f32 %v946_v12, %v849_v46 }
 0x1e3   : > { %v993_v13 = vpack.c.bf16 %v977_v57, %v973_v56 }
 0x1e4   : > { %v994_v2 = vpack.c.bf16 %v978_v1, %v974_v0 }
 0x1e6   : > { %1526 = vmatprep.mubr.bf16.mxu0 %v994_v2 }
 0x1e7   : > { %1527 = vmatmul.mubr.bf16.gmra.mrb[12].mxu0 %v993_v13 }
 0x2a2   : > { %v1498_v6 = vpop.f32.mrb[0].mxu0 }
 0x2a3   : > { %v1868_v7 = vadd.f32 %v1498_v6, %v1064_v4  ;;  %v1500_v8 = vpop.f32.mrb[1].mxu0 }
 0x2a4   : > { %v1869_v9 = vadd.f32 %v1500_v8, %v1068_v5  ;;  %v1502_v10 = vpop.f32.mrb[2].mxu0 }
 0x2a5   : > { %v1870_v11 = vadd.f32 %v1502_v10, %v1064_v4  ;;  %v1504_v14 = vpop.f32.mrb[3].mxu0 }
 0x2a6   : > { %v1858_v16 = vpack.c.bf16 %v1869_v9, %v1868_v7  ;;  %v1871_v17 = vadd.f32 %v1504_v14, %v1068_v5 }
 0x2a8   : > { %1585 = vst [vmem:[%s2666_s13] sm:$0xff] %v1858_v16  ;;  %v1859_v59 = vpack.c.bf16 %v1871_v17, %v1870_v11 }
 0x2aa   : > { %1586 = vst [vmem:[%s2666_s13 + $0x8] sm:$0xff] %v1859_v59  ;;  %v1508_v58 = vpop.f32.mrb[4].mxu0 }
 0x2ab   : > { %v1872_v61 = vadd.f32 %v1508_v58, %v1064_v4  ;;  %v1510_v18 = vpop.f32.mrb[5].mxu0 }
 0x2ac   : > { %v1873_v19 = vadd.f32 %v1510_v18, %v1068_v5  ;;  %v1512_v20 = vpop.f32.mrb[6].mxu0 }
 0x2ad   : > { %v1874_v21 = vadd.f32 %v1512_v20, %v1064_v4  ;;  %v1514_v22 = vpop.f32.mrb[7].mxu0 }
 0x2ae   : > { %v1860_v23 = vpack.c.bf16 %v1873_v19, %v1872_v61  ;;  %v1875_v24 = vadd.f32 %v1514_v22, %v1068_v5 }
 0x2b0   : > { %1587 = vst [vmem:[%s2666_s13 + $0x10] sm:$0xff] %v1860_v23  ;;  %v1861_v25 = vpack.c.bf16 %v1875_v24, %v1874_v21 }
 0x2b2   : > { %1588 = vst [vmem:[%s2666_s13 + $0x18] sm:$0xff] %v1861_v25  ;;  %v1518_v26 = vpop.f32.mrb[8].mxu0 }
 0x2b3   : > { %v1876_v60 = vadd.f32 %v1518_v26, %v1064_v4  ;;  %v1520_v27 = vpop.f32.mrb[9].mxu0 }
 0x2b4   : > { %v1877_v28 = vadd.f32 %v1520_v27, %v1068_v5  ;;  %v1522_v29 = vpop.f32.mrb[10].mxu0 }
 0x2b5   : > { %v1878_v30 = vadd.f32 %v1522_v29, %v1064_v4  ;;  %v1524_v31 = vpop.f32.mrb[11].mxu0 }
 0x2b6   : > { %v1862_v32 = vpack.c.bf16 %v1877_v28, %v1876_v60  ;;  %v1879_v33 = vadd.f32 %v1524_v31, %v1068_v5 }
 0x2b8   : > { %1589 = vst [vmem:[%s2666_s13 + $0x20] sm:$0xff] %v1862_v32  ;;  %v1863_v34 = vpack.c.bf16 %v1879_v33, %v1878_v30 }
 0x2ba   : > { %1590 = vst [vmem:[%s2666_s13 + $0x28] sm:$0xff] %v1863_v34  ;;  %v1528_v35 = vpop.f32.mrb[12].mxu0 }
 0x2bb   : > { %v1880_v36 = vadd.f32 %v1528_v35, %v1064_v4  ;;  %v1530_v37 = vpop.f32.mrb[13].mxu0 }
 0x2bc   : > { %v1881_v38 = vadd.f32 %v1530_v37, %v1068_v5  ;;  %v1532_v39 = vpop.f32.mrb[14].mxu0 }
 0x2bd   : > { %v1882_v15 = vadd.f32 %v1532_v39, %v1064_v4  ;;  %v1534_v40 = vpop.f32.mrb[15].mxu0 }
 0x2be   : > { %v1864_v41 = vpack.c.bf16 %v1881_v38, %v1880_v36  ;;  %v1883_v42 = vadd.f32 %v1534_v40, %v1068_v5 }
 0x2c0   : > { %1591 = vst [vmem:[%s2666_s13 + $0x30] sm:$0xff] %v1864_v41  ;;  %v1865_v43 = vpack.c.bf16 %v1883_v42, %v1882_v15 }
 0x2c2   : > { %1592 = vst [vmem:[%s2666_s13 + $0x38] sm:$0xff] %v1865_v43 }
 0x2c3   : > { %2264 = shalt.err (!%p2261_p1)
}
 0x2c4   : > { %s2265_s24 = scalar_lea.hbm %s2681_s30, 1024  ;;  %s2269_s16 = scalar_lea.hbm %s2732_s5, 2048 }
 0x2c5   : > { %p2266_p13 = scmp.ne.s32.totalorder %s2681_s30, %s2265_s24  ;;  %p2270_p4 = scmp.lt.u32.totalorder %s2681_s30, %s2732_s5 }
 0x2c6   : > { %p2271_p7 = scmp.lt.u32.totalorder %s2269_s16, %s2265_s24  ;;  %p2273_p11 = scmp.lt.u32.totalorder %s2265_s24, %s2681_s30 }
 0x2c7   : > { %p2267_p6 = pnand %p2266_p13, %p2746_p0 }
 0x2c8   : > { %p2272_p8 = por %p2271_p7, %p2270_p4 }
 0x2c9   : > { %p2268_p10 = pneg %p2267_p6 }
 0x2ca   : > { %p2274_p2 = por %p2273_p11, %p2272_p8 }
 0x2cc   : > { %p2275_p3 = pnand %p2274_p2, %p2268_p10 }
 0x2ce   : > { %2278 = shalt.err (!%p2275_p3)
}
 0x2cf   : > { %s2331_s17 = smov 128   ;;  %s2332_s29 = smov 8  }
 0x2d0   : > { %1910 = dma.vmem_to_hbm [thread:$0]  (%p2746_p0), %s2676_s14, 1024, %s2681_s30, %s1594_s9, %s2331_s17, %s2331_s17, %s2332_s29  }
 0x2d1 PF: > { %s1623_s12 = sand.u32 1, %s2309_s18   ;;  %p2747_p5 = scmp.ne.s32.totalorder %s2737_s25, 0 }
 0x2d2   : > { %p2748_p9 = scmp.ge.s32.totalorder %s2321_s21, 2  ;;  %s1624_s6 = scalar_lea.sflag [#allocation4], %s1623_s12 }
 0x2d4   : > { %p1924_p12 = pnand %p2748_p9, %p2747_p5 }
 0x2d6   : > { %2304 = dma.done.wait (!%p1924_p12), %s1624_s6, 1024  }
 0x2d7   : > { %2306 = vsyncadd (!%p1924_p12), %s1624_s6, 4294966272  ;;  %p19_p1 = scmp.ge.s32.totalorder %s2476_s23, 4   ;;  %s2749_s18 = smov %s2313_s19 }
 0x2d8   : > { %s2750_s19 = smov %s2317_s20  ;;  %s2751_s20 = smov %s2485_s7 }
 0x2d9   : > { %s2752_s21 = smov %s2476_s23  ;;  %21 = sbr.rel (!%p19_p1) target bundleno = 6 (0x6), region = 93 }
 0x2e0   :  { %1629 = vsyncpa [#allocation3], 1 }
 0x2e1   :  { %1631 = vsyncpa [#allocation3 + $0x1], 1 }
 0x2e2   :  { %1632 = vsyncpa [#allocation6], 1 }
 0x2e3   :  { %1633 = vsyncpa [#allocation4], 1 }
 0x2e4   :  { %1635 = vsyncpa [#allocation4 + $0x1], 1 }

</bundles_post_ra>
